<compile_context>
chip_gen: v5e
topology: v5e:2x2
jax: 0.10.0
libtpu: 0.0.40
codegen_flags: <defaults>
</compile_context>

<pallas_src>
import functools

import jax
import jax.numpy as jnp
from jax import lax
from jax.experimental import pallas as pl
from jax.experimental.pallas import tpu as pltpu

EPS = 1e-5


def _round_up(x, m):
    return (x + m - 1) // m * m


# ---------------------------------------------------------------------------
# Banded weight matrices (built once per weight update, merged width*channel lanes)
# ---------------------------------------------------------------------------
def _upconv_band(w_up, ky, wb, wp_out, n_pad):
    """ConvTranspose2d width scatter for one ky tap, lane-padded to n_pad columns.

    w_up: (CB, CR, 3, 3) PyTorch layout.  A[ix*CB+ci, (2*ix+kx+1)*CR+co] = w_up[ci,co,ky,kx]
    (the +1 is the width halo of the downstream pad=1 convs)."""
    cb, cr = w_up.shape[0], w_up.shape[1]
    a = jnp.zeros((wb, cb, wp_out, cr), jnp.float32)
    ix = jnp.arange(wb)
    for kx in range(3):
        a = a.at[ix, :, 2 * ix + kx + 1, :].add(
            jnp.broadcast_to(w_up[:, :, ky, kx], (wb, cb, cr)))
    a = a.reshape(wb * cb, wp_out * cr)
    return jnp.pad(a, ((0, 0), (0, n_pad - wp_out * cr)))


def _conv_band(w_oihw, dy, wo, wp_in, wp_out, out_off, k_pad, n_pad):
    """3x3 pad=1 conv, one dy tap, as a band matrix on merged (width*channel) lanes.

    w_oihw: (Cout, Cin, 3, 3) with BN scale already folded in.  Zero-padded to
    (k_pad, n_pad) so both K and N are lane-dense multiples of 128."""
    cout, cin = w_oihw.shape[0], w_oihw.shape[1]
    b = jnp.zeros((wp_in, cin, wp_out, cout), jnp.float32)
    w = jnp.arange(wo)
    for dx in range(3):
        b = b.at[w + dx, :, w + out_off, :].add(
            jnp.broadcast_to(w_oihw[:, :, dy, dx].T, (wo, cin, cout)))
    b = b.reshape(wp_in * cin, wp_out * cout)
    return jnp.pad(b, ((0, k_pad - wp_in * cin), (0, n_pad - wp_out * cout)))


def build_unet_up_tables(p, HB, WB):
    """Fold inference BatchNorm + build lane-dense band matrices.  Run once per weight update."""
    CB, CR = p["w_up"].shape[0], p["w_up"].shape[1]
    CL = p["w1"].shape[1] - CR
    Ho, Wo = 2 * HB + 1, 2 * WB + 1
    Wp = Wo + 2
    WBCB = WB * CB
    FBL = _round_up(Wp * CR, 128)     # from_bottom / conv1-out lane width
    LL = _round_up(Wp * CL, 128)      # left lane width
    OL = _round_up(Wo * CR, 128)      # final output lane width
    BKL = _round_up(WBCB, 128)        # bottom lane block inside the even-phase LHS

    s1 = p["g1"] / jnp.sqrt(p["v1"] + EPS)
    s2 = p["g2"] / jnp.sqrt(p["v2"] + EPS)
    w1s = p["w1"] * s1[:, None, None, None]
    w2s = p["w2"] * s2[:, None, None, None]
    bias1 = p["beta1"] + (p["b1"] - p["m1"]) * s1
    bias2 = p["beta2"] + (p["b2"] - p["m2"]) * s2

    a0 = _upconv_band(p["w_up"], 0, WB, Wp, FBL)
    a1 = _upconv_band(p["w_up"], 1, WB, Wp, FBL)
    a2 = _upconv_band(p["w_up"], 2, WB, Wp, FBL)
    # Even-phase band: K-stacked (ky=0, ky=2) taps on two 128-aligned lane blocks.
    a_even = jnp.zeros((2 * BKL, FBL), jnp.float32)
    a_even = a_even.at[:WBCB].set(a0).at[BKL:BKL + WBCB].set(a2)

    # conv1 band over the [from_bottom | left] concat (K rows ordered to match the scratch).
    b1 = jnp.stack([
        jnp.concatenate([
            _conv_band(w1s[:, CL:], dy, Wo, Wp, Wp, 1, FBL, FBL),   # from_bottom part
            _conv_band(w1s[:, :CL], dy, Wo, Wp, Wp, 1, LL, FBL),    # left part
        ], axis=0)
        for dy in range(3)])
    b2 = jnp.stack([_conv_band(w2s, dy, Wo, Wp, Wo, 0, FBL, OL) for dy in range(3)])

    # Per-channel biases as lane rows (zero on halo + pad lanes).
    pad_fb = lambda row: jnp.pad(row, ((0, 0), (0, FBL - Wp * CR)))
    bup_row = pad_fb(jnp.zeros((Wp, CR), jnp.float32).at[1:Wo + 1].set(p["b_up"])
                     .reshape(1, Wp * CR))
    b1_row = pad_fb(jnp.zeros((Wp, CR), jnp.float32).at[1:Wo + 1].set(bias1)
                    .reshape(1, Wp * CR))
    b2_row = jnp.pad(jnp.broadcast_to(bias2, (Wo, CR)).reshape(1, Wo * CR),
                     ((0, 0), (0, OL - Wo * CR)))

    return dict(a_even=a_even, a_odd=a1, b1=b1, b2=b2,
                bup_row=bup_row, b1_row=b1_row, b2_row=b2_row)


# ---------------------------------------------------------------------------
# Fused UNetUp kernel (one image per grid step, everything resident in VMEM)
# ---------------------------------------------------------------------------
def _unet_up_kernel(bottom_ref, left_ref, a_even_ref, a_odd_ref, b1_ref, b2_ref,
                    bup_ref, bias1_ref, bias2_ref, o_ref,
                    bcat_ref, cat_ref, r1_ref, *, HB, Ho, WBCB, BKL, FBL):
    f32 = jnp.float32
    bot = bottom_ref[0]                                     # (HB, WBCB)

    # ---- ConvTranspose2d(k=3, s=2): row-polyphase, width scatter folded into the bands ----
    # bcat row m = [bottom[m] | bottom[m-1]] on two 128-aligned lane blocks; the even output
    # rows are then ONE dot against the K-stacked (ky=0, ky=2) band.  The filler lanes must
    # be exact zeros (they multiply zero band rows), hence the small (HB+1, 2*BKL) zero fill.
    bcat_ref[...] = jnp.zeros_like(bcat_ref)
    bcat_ref[0:HB, 0:WBCB] = bot
    bcat_ref[1:HB + 1, BKL:BKL + WBCB] = bot
    e_fb = jnp.dot(bcat_ref[...], a_even_ref[...], preferred_element_type=f32)  # (HB+1, FBL)
    o_fb = jnp.dot(bot, a_odd_ref[...], preferred_element_type=f32)             # (HB,   FBL)

    # Row-phase interleave (fb[2m]=e_fb[m], fb[2m+1]=o_fb[m]) as two tiny permutation
    # matmuls on the otherwise-idle MXU -> one wide slab store instead of 2*HB+1 masked
    # single-row stores.
    r_e = lax.broadcasted_iota(jnp.int32, (Ho, HB + 1), 0)
    c_e = lax.broadcasted_iota(jnp.int32, (Ho, HB + 1), 1)
    r_o = lax.broadcasted_iota(jnp.int32, (Ho, HB), 0)
    c_o = lax.broadcasted_iota(jnp.int32, (Ho, HB), 1)
    p_even = (r_e == 2 * c_e).astype(f32)
    p_odd = (r_o == 2 * c_o + 1).astype(f32)
    fb = (jnp.dot(p_even, e_fb, preferred_element_type=f32)
          + jnp.dot(p_odd, o_fb, preferred_element_type=f32)
          + bup_ref[...])                                   # (Ho, FBL); halo/pad lanes stay 0

    # ---- channel concat [from_bottom | left] staged once in a halo-padded VMEM slab -------
    cat_ref[:, FBL:] = left_ref[0]                          # left half (wrapper zero-pads halo)
    cat_ref[0:1, 0:FBL] = jnp.zeros((1, FBL), f32)          # fb vertical halo rows only
    cat_ref[Ho + 1:Ho + 2, 0:FBL] = jnp.zeros((1, FBL), f32)
    cat_ref[1:Ho + 1, 0:FBL] = fb

    # ---- conv1 (+ folded BN) + ReLU: 3 wide-K banded dots ----------------------------------
    catv = cat_ref[...]                                     # (Hp, FBL+LL)
    acc1 = bias1_ref[...]
    for dy in range(3):
        acc1 = acc1 + jnp.dot(catv[dy:dy + Ho, :], b1_ref[dy], preferred_element_type=f32)
    r1_ref[0:1, :] = jnp.zeros((1, FBL), f32)               # halo rows only
    r1_ref[Ho + 1:Ho + 2, :] = jnp.zeros((1, FBL), f32)
    r1_ref[1:Ho + 1, :] = jnp.maximum(acc1, 0.0)

    # ---- conv2 (+ folded BN) + ReLU --------------------------------------------------------
    r1v = r1_ref[...]                                       # (Hp, FBL)
    acc2 = bias2_ref[...]
    for dy in range(3):
        acc2 = acc2 + jnp.dot(r1v[dy:dy + Ho, :], b2_ref[dy], preferred_element_type=f32)
    o_ref[...] = jnp.maximum(acc2, 0.0)[None].astype(o_ref.dtype)


# ---------------------------------------------------------------------------
# UNetUp forward (Pallas path). Inputs/outputs are NCHW like the PyTorch module.
# ---------------------------------------------------------------------------
def unet_up_forward(left_nchw, bottom_nchw, tables, *, right_channels):
    N, CB, HB, WB = bottom_nchw.shape
    _, CL, _, _ = left_nchw.shape
    CR = right_channels
    Ho, Wo = 2 * HB + 1, 2 * WB + 1                     # ConvTranspose(k=3, s=2) output size
    Hp, Wp = Ho + 2, Wo + 2                             # +1 halo for the pad=1 convs
    WBCB = WB * CB

    a_even, a_odd = tables["a_even"], tables["a_odd"]
    b1, b2 = tables["b1"], tables["b2"]
    bup_row, b1_row, b2_row = tables["bup_row"], tables["b1_row"], tables["b2_row"]
    BKL = a_even.shape[0] // 2
    FBL = a_even.shape[1]
    LL = b1.shape[1] - FBL
    OL = b2.shape[2]

    # TODO(synk): a real decoder would keep activations NHWC (merged-lane) end-to-end and
    #             drop these transposes; kept so the public interface matches NCHW PyTorch.
    bottom2d = jnp.transpose(bottom_nchw, (0, 2, 3, 1)).reshape(N, HB, WBCB)
    left2d = jnp.pad(jnp.transpose(left_nchw, (0, 2, 3, 1)),
                     ((0, 0), (1, 1), (1, 1), (0, 0))).reshape(N, Hp, Wp * CL)
    left2d = jnp.pad(left2d, ((0, 0), (0, 0), (0, LL - Wp * CL)))   # lane-dense (128x)

    out = pl.pallas_call(
        functools.partial(_unet_up_kernel, HB=HB, Ho=Ho, WBCB=WBCB, BKL=BKL, FBL=FBL),
        out_shape=jax.ShapeDtypeStruct((N, Ho, OL), jnp.float32),
        grid=(N,),
        in_specs=[
            pl.BlockSpec((1, HB, WBCB), lambda i: (i, 0, 0)),        # bottom rows
            pl.BlockSpec((1, Hp, LL), lambda i: (i, 0, 0)),          # padded left rows
            pl.BlockSpec((2 * BKL, FBL), lambda i: (0, 0)),          # up-conv even band
            pl.BlockSpec((WBCB, FBL), lambda i: (0, 0)),             # up-conv odd band
            pl.BlockSpec((3, FBL + LL, FBL), lambda i: (0, 0, 0)),   # conv1 bands
            pl.BlockSpec((3, FBL, OL), lambda i: (0, 0, 0)),         # conv2 bands
            pl.BlockSpec((1, FBL), lambda i: (0, 0)),                # up-conv bias row
            pl.BlockSpec((1, FBL), lambda i: (0, 0)),                # conv1 bias row
            pl.BlockSpec((1, OL), lambda i: (0, 0)),                 # conv2 bias row
        ],
        out_specs=pl.BlockSpec((1, Ho, OL), lambda i: (i, 0, 0)),
        scratch_shapes=[
            pltpu.VMEM((HB + 1, 2 * BKL), jnp.float32),  # even-phase LHS [bot[m] | bot[m-1]]
            pltpu.VMEM((Hp, FBL + LL), jnp.float32),     # concat(from_bottom, left), haloed
            pltpu.VMEM((Hp, FBL), jnp.float32),          # conv1 result, haloed
        ],
        compiler_params=pltpu.CompilerParams(
            dimension_semantics=("parallel",),           # v7x: one image per TensorCore
        ),
    )(bottom2d, left2d, a_even, a_odd, b1, b2, bup_row, b1_row, b2_row)

    out = out[:, :, :Wo * CR].reshape(N, Ho, Wo, CR)     # drop lane padding
    return jnp.transpose(out, (0, 3, 1, 2))              # back to NCHW


# ---------------------------------------------------------------------------
# Deterministic parameter init (shapes follow the PyTorch module __init__)
# ---------------------------------------------------------------------------
def init_params(key, cb, cl, cr):
    ks = jax.random.split(key, 16)
    n = lambda k, shape: 0.1 * jax.random.normal(k, shape, jnp.float32)
    p = {}
    p["w_up"] = n(ks[0], (cb, cr, 3, 3))        # ConvTranspose2d(cb, cr, 3, stride=2)
    p["b_up"] = n(ks[1], (cr,))
    p["w1"] = n(ks[2], (cr, cl + cr, 3, 3))     # Conv2d(cl+cr, cr, 3, pad=1) + BN
    p["b1"] = n(ks[3], (cr,))
    p["g1"] = 1.0 + n(ks[4], (cr,))
    p["beta1"] = n(ks[5], (cr,))
    p["m1"] = n(ks[6], (cr,))
    p["v1"] = 1.0 + 0.1 * jnp.abs(jax.random.normal(ks[7], (cr,), jnp.float32))
    p["w2"] = n(ks[8], (cr, cr, 3, 3))          # Conv2d(cr, cr, 3, pad=1) + BN
    p["b2"] = n(ks[9], (cr,))
    p["g2"] = 1.0 + n(ks[10], (cr,))
    p["beta2"] = n(ks[11], (cr,))
    p["m2"] = n(ks[12], (cr,))
    p["v2"] = 1.0 + 0.1 * jnp.abs(jax.random.normal(ks[13], (cr,), jnp.float32))
    return p


# ---------------------------------------------------------------------------
# Pure-JAX reference (lax convolutions) for a correctness cross-check
# ---------------------------------------------------------------------------
def ref_forward(left, bottom, p):
    w_up = jnp.transpose(p["w_up"][:, :, ::-1, ::-1], (1, 0, 2, 3))  # OIHW, flipped
    fb = lax.conv_general_dilated(bottom, w_up, (1, 1), ((2, 2), (2, 2)),
                                  lhs_dilation=(2, 2),
                                  dimension_numbers=("NCHW", "OIHW", "NCHW"))
    fb = fb + p["b_up"][None, :, None, None]

    def cbr(x, w, b, g, beta, m, v):
        y = lax.conv_general_dilated(x, w, (1, 1), ((1, 1), (1, 1)),
                                     dimension_numbers=("NCHW", "OIHW", "NCHW"))
        y = y + b[None, :, None, None]
        y = (y - m[None, :, None, None]) / jnp.sqrt(v[None, :, None, None] + EPS)
        y = y * g[None, :, None, None] + beta[None, :, None, None]
        return jnp.maximum(y, 0.0)

    x = jnp.concatenate([left, fb], axis=1)
    r1 = cbr(x, p["w1"], p["b1"], p["g1"], p["beta1"], p["m1"], p["v1"])
    r2 = cbr(r1, p["w2"], p["b2"], p["g2"], p["beta2"], p["m2"], p["v2"])
    return r2


if __name__ == "__main__":
    key = jax.random.PRNGKey(0)
    kp, kl, kb = jax.random.split(key, 3)

    CB, CL, CR = 6, 5, 4              # bottom / left / right channels
    N, HB, WB = 2, 7, 7               # bottom spatial
    HL, WL = 2 * HB + 1, 2 * WB + 1   # 15x15: matches ConvTranspose(k=3, s=2) output

    params = init_params(kp, CB, CL, CR)
    left = jax.random.normal(kl, (N, CL, HL, WL), jnp.float32)
    bottom = jax.random.normal(kb, (N, CB, HB, WB), jnp.float32)

    # Band matrices / BN folding built ONCE (out of the per-forward hot path).
    tables = build_unet_up_tables(params, HB, WB)

    fwd = jax.jit(functools.partial(unet_up_forward, right_channels=CR))
    out = jax.block_until_ready(fwd(left, bottom, tables))
    assert out.shape == (N, CR, HL, WL), out.shape

    ref = ref_forward(left, bottom, params)
    assert jnp.allclose(out, ref, atol=1e-4, rtol=1e-4), \
        float(jnp.max(jnp.abs(out - ref)))

    print("KERNEL_OK")
</pallas_src>

<mosaic_0001>
module attributes {stable_mosaic.version = 11 : i64} {
  func.func @_unet_up_kernel(%arg0: i32, %arg1: memref<1x7x42xf32, #tpu.memory_space<vmem>>, %arg2: memref<1x17x128xf32, #tpu.memory_space<vmem>>, %arg3: memref<256x128xf32, #tpu.memory_space<vmem>>, %arg4: memref<42x128xf32, #tpu.memory_space<vmem>>, %arg5: memref<3x256x128xf32, #tpu.memory_space<vmem>>, %arg6: memref<3x128x128xf32, #tpu.memory_space<vmem>>, %arg7: memref<1x128xf32, #tpu.memory_space<vmem>>, %arg8: memref<1x128xf32, #tpu.memory_space<vmem>>, %arg9: memref<1x128xf32, #tpu.memory_space<vmem>>, %arg10: memref<1x15x128xf32, #tpu.memory_space<vmem>>, %arg11: memref<8x256xf32, #tpu.memory_space<vmem>>, %arg12: memref<17x256xf32, #tpu.memory_space<vmem>>, %arg13: memref<17x128xf32, #tpu.memory_space<vmem>>) attributes {dimension_semantics = [#tpu.dimension_semantics<parallel>], iteration_bounds = array<i64: 2>, scalar_prefetch = 0 : i64, scratch_operands = 3 : i64, tpu.core_type = #tpu.core_type<tc>, window_params = [{transform_indices = @transform_0, window_bounds = array<i64: 1, 7, 42>}, {transform_indices = @transform_1, window_bounds = array<i64: 1, 17, 128>}, {pipeline_mode = #tpu.pipeline_mode<synchronous>, transform_indices = @transform_2, window_bounds = array<i64: 256, 128>}, {pipeline_mode = #tpu.pipeline_mode<synchronous>, transform_indices = @transform_3, window_bounds = array<i64: 42, 128>}, {pipeline_mode = #tpu.pipeline_mode<synchronous>, transform_indices = @transform_4, window_bounds = array<i64: 3, 256, 128>}, {pipeline_mode = #tpu.pipeline_mode<synchronous>, transform_indices = @transform_5, window_bounds = array<i64: 3, 128, 128>}, {pipeline_mode = #tpu.pipeline_mode<synchronous>, transform_indices = @transform_6, window_bounds = array<i64: 1, 128>}, {pipeline_mode = #tpu.pipeline_mode<synchronous>, transform_indices = @transform_7, window_bounds = array<i64: 1, 128>}, {pipeline_mode = #tpu.pipeline_mode<synchronous>, transform_indices = @transform_8, window_bounds = array<i64: 1, 128>}, {transform_indices = @transform_9, window_bounds = array<i64: 1, 15, 128>}]} {
    %c0 = arith.constant 0 : index
    %c0_0 = arith.constant 0 : index
    %c0_1 = arith.constant 0 : index
    %0 = vector.load %arg1[%c0, %c0_0, %c0_1] : memref<1x7x42xf32, #tpu.memory_space<vmem>>, vector<1x7x42xf32>
    %1 = vector.shape_cast %0 : vector<1x7x42xf32> to vector<7x42xf32>
    %cst = arith.constant 0.000000e+00 : f32
    %2 = vector.broadcast %cst : f32 to vector<8x256xf32>
    %c0_2 = arith.constant 0 : index
    %c0_3 = arith.constant 0 : index
    %3 = vector.load %arg11[%c0_2, %c0_3] : memref<8x256xf32, #tpu.memory_space<vmem>>, vector<8x256xf32>
    tpu.vector_store %arg11[%c0_2, %c0_3], %2 {strides = array<i32>} : memref<8x256xf32, #tpu.memory_space<vmem>>, vector<8x256xf32>,
    %c0_4 = arith.constant 0 : index
    %c0_5 = arith.constant 0 : index
    %4 = vector.load %arg11[%c0_4, %c0_5] : memref<8x256xf32, #tpu.memory_space<vmem>>, vector<7x42xf32>
    tpu.vector_store %arg11[%c0_4, %c0_5], %1 {strides = array<i32>} : memref<8x256xf32, #tpu.memory_space<vmem>>, vector<7x42xf32>,
    %c1 = arith.constant 1 : index
    %c128 = arith.constant 128 : index
    %5 = vector.load %arg11[%c1, %c128] : memref<8x256xf32, #tpu.memory_space<vmem>>, vector<7x42xf32>
    tpu.vector_store %arg11[%c1, %c128], %1 {strides = array<i32>} : memref<8x256xf32, #tpu.memory_space<vmem>>, vector<7x42xf32>,
    %c0_6 = arith.constant 0 : index
    %c0_7 = arith.constant 0 : index
    %6 = vector.load %arg11[%c0_6, %c0_7] : memref<8x256xf32, #tpu.memory_space<vmem>>, vector<8x256xf32>
    %c0_8 = arith.constant 0 : index
    %c0_9 = arith.constant 0 : index
    %7 = vector.load %arg3[%c0_8, %c0_9] : memref<256x128xf32, #tpu.memory_space<vmem>>, vector<256x128xf32>
    %cst_10 = arith.constant dense<0.000000e+00> : vector<8x128xf32>
    %8 = tpu.matmul %6, %7, %cst_10 {dimension_numbers = #tpu.dot_dimension_numbers<[1], [0], [0], [1], [0, 0, 1, 1], [], []>} : vector<8x256xf32>, vector<256x128xf32>, vector<8x128xf32> -> vector<8x128xf32>
    %c0_11 = arith.constant 0 : index
    %c0_12 = arith.constant 0 : index
    %9 = vector.load %arg4[%c0_11, %c0_12] : memref<42x128xf32, #tpu.memory_space<vmem>>, vector<42x128xf32>
    %cst_13 = arith.constant dense<0.000000e+00> : vector<7x128xf32>
    %10 = tpu.matmul %1, %9, %cst_13 {dimension_numbers = #tpu.dot_dimension_numbers<[1], [0], [0], [1], [0, 0, 1, 1], [], []>} : vector<7x42xf32>, vector<42x128xf32>, vector<7x128xf32> -> vector<7x128xf32>
    %11 = tpu.iota {dimensions = array<i32: 0>} : vector<15x8xi32>
    %12 = tpu.iota {dimensions = array<i32: 1>} : vector<15x8xi32>
    %13 = tpu.iota {dimensions = array<i32: 0>} : vector<15x7xi32>
    %14 = tpu.iota {dimensions = array<i32: 1>} : vector<15x7xi32>
    %c2_i32 = arith.constant 2 : i32
    %15 = vector.broadcast %c2_i32 : i32 to vector<15x8xi32>
    %16 = arith.muli %15, %12 : vector<15x8xi32>
    %17 = arith.cmpi eq, %11, %16 : vector<15x8xi32>
    %18 = arith.extui %17 : vector<15x8xi1> to vector<15x8xi32>
    %19 = arith.sitofp %18 : vector<15x8xi32> to vector<15x8xf32>
    %c2_i32_14 = arith.constant 2 : i32
    %20 = vector.broadcast %c2_i32_14 : i32 to vector<15x7xi32>
    %21 = arith.muli %20, %14 : vector<15x7xi32>
    %c1_i32 = arith.constant 1 : i32
    %22 = vector.broadcast %c1_i32 : i32 to vector<15x7xi32>
    %23 = arith.addi %21, %22 : vector<15x7xi32>
    %24 = arith.cmpi eq, %13, %23 : vector<15x7xi32>
    %25 = arith.extui %24 : vector<15x7xi1> to vector<15x7xi32>
    %26 = arith.sitofp %25 : vector<15x7xi32> to vector<15x7xf32>
    %cst_15 = arith.constant dense<0.000000e+00> : vector<15x128xf32>
    %27 = tpu.matmul %19, %8, %cst_15 {dimension_numbers = #tpu.dot_dimension_numbers<[1], [0], [0], [1], [0, 0, 1, 1], [], []>} : vector<15x8xf32>, vector<8x128xf32>, vector<15x128xf32> -> vector<15x128xf32>
    %cst_16 = arith.constant dense<0.000000e+00> : vector<15x128xf32>
    %28 = tpu.matmul %26, %10, %cst_16 {dimension_numbers = #tpu.dot_dimension_numbers<[1], [0], [0], [1], [0, 0, 1, 1], [], []>} : vector<15x7xf32>, vector<7x128xf32>, vector<15x128xf32> -> vector<15x128xf32>
    %29 = arith.addf %27, %28 : vector<15x128xf32>
    %c0_17 = arith.constant 0 : index
    %c0_18 = arith.constant 0 : index
    %30 = vector.load %arg7[%c0_17, %c0_18] : memref<1x128xf32, #tpu.memory_space<vmem>>, vector<1x128xf32>
    %31 = vector.broadcast %30 : vector<1x128xf32> to vector<15x128xf32>
    %32 = arith.addf %29, %31 : vector<15x128xf32>
    %c0_19 = arith.constant 0 : index
    %c0_20 = arith.constant 0 : index
    %c0_21 = arith.constant 0 : index
    %33 = vector.load %arg2[%c0_19, %c0_20, %c0_21] : memref<1x17x128xf32, #tpu.memory_space<vmem>>, vector<1x17x128xf32>
    %34 = vector.shape_cast %33 : vector<1x17x128xf32> to vector<17x128xf32>
    %c0_22 = arith.constant 0 : index
    %c128_23 = arith.constant 128 : index
    %35 = vector.load %arg12[%c0_22, %c128_23] : memref<17x256xf32, #tpu.memory_space<vmem>>, vector<17x128xf32>
    tpu.vector_store %arg12[%c0_22, %c128_23], %34 {strides = array<i32>} : memref<17x256xf32, #tpu.memory_space<vmem>>, vector<17x128xf32>,
    %cst_24 = arith.constant 0.000000e+00 : f32
    %36 = vector.broadcast %cst_24 : f32 to vector<1x128xf32>
    %c0_25 = arith.constant 0 : index
    %c0_26 = arith.constant 0 : index
    %37 = vector.load %arg12[%c0_25, %c0_26] : memref<17x256xf32, #tpu.memory_space<vmem>>, vector<1x128xf32>
    tpu.vector_store %arg12[%c0_25, %c0_26], %36 {strides = array<i32>} : memref<17x256xf32, #tpu.memory_space<vmem>>, vector<1x128xf32>,
    %cst_27 = arith.constant 0.000000e+00 : f32
    %38 = vector.broadcast %cst_27 : f32 to vector<1x128xf32>
    %c16 = arith.constant 16 : index
    %c0_28 = arith.constant 0 : index
    %39 = vector.load %arg12[%c16, %c0_28] : memref<17x256xf32, #tpu.memory_space<vmem>>, vector<1x128xf32>
    tpu.vector_store %arg12[%c16, %c0_28], %38 {strides = array<i32>} : memref<17x256xf32, #tpu.memory_space<vmem>>, vector<1x128xf32>,
    %c1_29 = arith.constant 1 : index
    %c0_30 = arith.constant 0 : index
    %40 = vector.load %arg12[%c1_29, %c0_30] : memref<17x256xf32, #tpu.memory_space<vmem>>, vector<15x128xf32>
    tpu.vector_store %arg12[%c1_29, %c0_30], %32 {strides = array<i32>} : memref<17x256xf32, #tpu.memory_space<vmem>>, vector<15x128xf32>,
    %c0_31 = arith.constant 0 : index
    %c0_32 = arith.constant 0 : index
    %41 = vector.load %arg12[%c0_31, %c0_32] : memref<17x256xf32, #tpu.memory_space<vmem>>, vector<17x256xf32>
    %c0_33 = arith.constant 0 : index
    %c0_34 = arith.constant 0 : index
    %42 = vector.load %arg8[%c0_33, %c0_34] : memref<1x128xf32, #tpu.memory_space<vmem>>, vector<1x128xf32>
    %43 = vector.extract_strided_slice %41 {offsets = [0, 0], sizes = [15, 256], strides = [1, 1]} : vector<17x256xf32> to vector<15x256xf32>
    %c0_35 = arith.constant 0 : index
    %c0_36 = arith.constant 0 : index
    %c0_37 = arith.constant 0 : index
    %44 = vector.load %arg5[%c0_35, %c0_36, %c0_37] : memref<3x256x128xf32, #tpu.memory_space<vmem>>, vector<1x256x128xf32>
    %45 = vector.shape_cast %44 : vector<1x256x128xf32> to vector<256x128xf32>
    %cst_38 = arith.constant dense<0.000000e+00> : vector<15x128xf32>
    %46 = tpu.matmul %43, %45, %cst_38 {dimension_numbers = #tpu.dot_dimension_numbers<[1], [0], [0], [1], [0, 0, 1, 1], [], []>} : vector<15x256xf32>, vector<256x128xf32>, vector<15x128xf32> -> vector<15x128xf32>
    %47 = vector.broadcast %42 : vector<1x128xf32> to vector<15x128xf32>
    %48 = arith.addf %47, %46 : vector<15x128xf32>
    %49 = vector.extract_strided_slice %41 {offsets = [1, 0], sizes = [15, 256], strides = [1, 1]} : vector<17x256xf32> to vector<15x256xf32>
    %c1_39 = arith.constant 1 : index
    %c0_40 = arith.constant 0 : index
    %c0_41 = arith.constant 0 : index
    %50 = vector.load %arg5[%c1_39, %c0_40, %c0_41] : memref<3x256x128xf32, #tpu.memory_space<vmem>>, vector<1x256x128xf32>
    %51 = vector.shape_cast %50 : vector<1x256x128xf32> to vector<256x128xf32>
    %cst_42 = arith.constant dense<0.000000e+00> : vector<15x128xf32>
    %52 = tpu.matmul %49, %51, %cst_42 {dimension_numbers = #tpu.dot_dimension_numbers<[1], [0], [0], [1], [0, 0, 1, 1], [], []>} : vector<15x256xf32>, vector<256x128xf32>, vector<15x128xf32> -> vector<15x128xf32>
    %53 = arith.addf %48, %52 : vector<15x128xf32>
    %54 = vector.extract_strided_slice %41 {offsets = [2, 0], sizes = [15, 256], strides = [1, 1]} : vector<17x256xf32> to vector<15x256xf32>
    %c2 = arith.constant 2 : index
    %c0_43 = arith.constant 0 : index
    %c0_44 = arith.constant 0 : index
    %55 = vector.load %arg5[%c2, %c0_43, %c0_44] : memref<3x256x128xf32, #tpu.memory_space<vmem>>, vector<1x256x128xf32>
    %56 = vector.shape_cast %55 : vector<1x256x128xf32> to vector<256x128xf32>
    %cst_45 = arith.constant dense<0.000000e+00> : vector<15x128xf32>
    %57 = tpu.matmul %54, %56, %cst_45 {dimension_numbers = #tpu.dot_dimension_numbers<[1], [0], [0], [1], [0, 0, 1, 1], [], []>} : vector<15x256xf32>, vector<256x128xf32>, vector<15x128xf32> -> vector<15x128xf32>
    %58 = arith.addf %53, %57 : vector<15x128xf32>
    %cst_46 = arith.constant 0.000000e+00 : f32
    %59 = vector.broadcast %cst_46 : f32 to vector<1x128xf32>
    %c0_47 = arith.constant 0 : index
    %c0_48 = arith.constant 0 : index
    %60 = vector.load %arg13[%c0_47, %c0_48] : memref<17x128xf32, #tpu.memory_space<vmem>>, vector<1x128xf32>
    tpu.vector_store %arg13[%c0_47, %c0_48], %59 {strides = array<i32>} : memref<17x128xf32, #tpu.memory_space<vmem>>, vector<1x128xf32>,
    %cst_49 = arith.constant 0.000000e+00 : f32
    %61 = vector.broadcast %cst_49 : f32 to vector<1x128xf32>
    %c16_50 = arith.constant 16 : index
    %c0_51 = arith.constant 0 : index
    %62 = vector.load %arg13[%c16_50, %c0_51] : memref<17x128xf32, #tpu.memory_space<vmem>>, vector<1x128xf32>
    tpu.vector_store %arg13[%c16_50, %c0_51], %61 {strides = array<i32>} : memref<17x128xf32, #tpu.memory_space<vmem>>, vector<1x128xf32>,
    %cst_52 = arith.constant 0.000000e+00 : f32
    %63 = vector.broadcast %cst_52 : f32 to vector<15x128xf32>
    %64 = arith.maximumf %58, %63 : vector<15x128xf32>
    %c1_53 = arith.constant 1 : index
    %c0_54 = arith.constant 0 : index
    %65 = vector.load %arg13[%c1_53, %c0_54] : memref<17x128xf32, #tpu.memory_space<vmem>>, vector<15x128xf32>
    tpu.vector_store %arg13[%c1_53, %c0_54], %64 {strides = array<i32>} : memref<17x128xf32, #tpu.memory_space<vmem>>, vector<15x128xf32>,
    %c0_55 = arith.constant 0 : index
    %c0_56 = arith.constant 0 : index
    %66 = vector.load %arg13[%c0_55, %c0_56] : memref<17x128xf32, #tpu.memory_space<vmem>>, vector<17x128xf32>
    %c0_57 = arith.constant 0 : index
    %c0_58 = arith.constant 0 : index
    %67 = vector.load %arg9[%c0_57, %c0_58] : memref<1x128xf32, #tpu.memory_space<vmem>>, vector<1x128xf32>
    %68 = vector.extract_strided_slice %66 {offsets = [0, 0], sizes = [15, 128], strides = [1, 1]} : vector<17x128xf32> to vector<15x128xf32>
    %c0_59 = arith.constant 0 : index
    %c0_60 = arith.constant 0 : index
    %c0_61 = arith.constant 0 : index
    %69 = vector.load %arg6[%c0_59, %c0_60, %c0_61] : memref<3x128x128xf32, #tpu.memory_space<vmem>>, vector<1x128x128xf32>
    %70 = vector.shape_cast %69 : vector<1x128x128xf32> to vector<128x128xf32>
    %cst_62 = arith.constant dense<0.000000e+00> : vector<15x128xf32>
    %71 = tpu.matmul %68, %70, %cst_62 {dimension_numbers = #tpu.dot_dimension_numbers<[1], [0], [0], [1], [0, 0, 1, 1], [], []>} : vector<15x128xf32>, vector<128x128xf32>, vector<15x128xf32> -> vector<15x128xf32>
    %72 = vector.broadcast %67 : vector<1x128xf32> to vector<15x128xf32>
    %73 = arith.addf %72, %71 : vector<15x128xf32>
    %74 = vector.extract_strided_slice %66 {offsets = [1, 0], sizes = [15, 128], strides = [1, 1]} : vector<17x128xf32> to vector<15x128xf32>
    %c1_63 = arith.constant 1 : index
    %c0_64 = arith.constant 0 : index
    %c0_65 = arith.constant 0 : index
    %75 = vector.load %arg6[%c1_63, %c0_64, %c0_65] : memref<3x128x128xf32, #tpu.memory_space<vmem>>, vector<1x128x128xf32>
    %76 = vector.shape_cast %75 : vector<1x128x128xf32> to vector<128x128xf32>
    %cst_66 = arith.constant dense<0.000000e+00> : vector<15x128xf32>
    %77 = tpu.matmul %74, %76, %cst_66 {dimension_numbers = #tpu.dot_dimension_numbers<[1], [0], [0], [1], [0, 0, 1, 1], [], []>} : vector<15x128xf32>, vector<128x128xf32>, vector<15x128xf32> -> vector<15x128xf32>
    %78 = arith.addf %73, %77 : vector<15x128xf32>
    %79 = vector.extract_strided_slice %66 {offsets = [2, 0], sizes = [15, 128], strides = [1, 1]} : vector<17x128xf32> to vector<15x128xf32>
    %c2_67 = arith.constant 2 : index
    %c0_68 = arith.constant 0 : index
    %c0_69 = arith.constant 0 : index
    %80 = vector.load %arg6[%c2_67, %c0_68, %c0_69] : memref<3x128x128xf32, #tpu.memory_space<vmem>>, vector<1x128x128xf32>
    %81 = vector.shape_cast %80 : vector<1x128x128xf32> to vector<128x128xf32>
    %cst_70 = arith.constant dense<0.000000e+00> : vector<15x128xf32>
    %82 = tpu.matmul %79, %81, %cst_70 {dimension_numbers = #tpu.dot_dimension_numbers<[1], [0], [0], [1], [0, 0, 1, 1], [], []>} : vector<15x128xf32>, vector<128x128xf32>, vector<15x128xf32> -> vector<15x128xf32>
    %83 = arith.addf %78, %82 : vector<15x128xf32>
    %cst_71 = arith.constant 0.000000e+00 : f32
    %84 = vector.broadcast %cst_71 : f32 to vector<15x128xf32>
    %85 = arith.maximumf %83, %84 : vector<15x128xf32>
    %86 = vector.shape_cast %85 : vector<15x128xf32> to vector<1x15x128xf32>
    %c0_72 = arith.constant 0 : index
    %c0_73 = arith.constant 0 : index
    %c0_74 = arith.constant 0 : index
    %87 = vector.load %arg10[%c0_72, %c0_73, %c0_74] : memref<1x15x128xf32, #tpu.memory_space<vmem>>, vector<1x15x128xf32>
    tpu.vector_store %arg10[%c0_72, %c0_73, %c0_74], %86 {strides = array<i32>} : memref<1x15x128xf32, #tpu.memory_space<vmem>>, vector<1x15x128xf32>,
    return
  }
  func.func @transform_0(%arg0: i32) -> (i32, i32, i32) {
    %c0_i32 = arith.constant 0 : i32
    %c0_i32_0 = arith.constant 0 : i32
    %c0_i32_1 = arith.constant 0 : i32
    return %arg0, %c0_i32, %c0_i32_0 : i32, i32, i32
  }
  func.func @transform_1(%arg0: i32) -> (i32, i32, i32) {
    %c0_i32 = arith.constant 0 : i32
    %c0_i32_0 = arith.constant 0 : i32
    %c0_i32_1 = arith.constant 0 : i32
    return %arg0, %c0_i32, %c0_i32_0 : i32, i32, i32
  }
  func.func @transform_2(%arg0: i32) -> (i32, i32) {
    %c0_i32 = arith.constant 0 : i32
    %c0_i32_0 = arith.constant 0 : i32
    %c0_i32_1 = arith.constant 0 : i32
    return %c0_i32, %c0_i32_0 : i32, i32
  }
  func.func @transform_3(%arg0: i32) -> (i32, i32) {
    %c0_i32 = arith.constant 0 : i32
    %c0_i32_0 = arith.constant 0 : i32
    %c0_i32_1 = arith.constant 0 : i32
    return %c0_i32, %c0_i32_0 : i32, i32
  }
  func.func @transform_4(%arg0: i32) -> (i32, i32, i32) {
    %c0_i32 = arith.constant 0 : i32
    %c0_i32_0 = arith.constant 0 : i32
    %c0_i32_1 = arith.constant 0 : i32
    %c0_i32_2 = arith.constant 0 : i32
    return %c0_i32, %c0_i32_0, %c0_i32_1 : i32, i32, i32
  }
  func.func @transform_5(%arg0: i32) -> (i32, i32, i32) {
    %c0_i32 = arith.constant 0 : i32
    %c0_i32_0 = arith.constant 0 : i32
    %c0_i32_1 = arith.constant 0 : i32
    %c0_i32_2 = arith.constant 0 : i32
    return %c0_i32, %c0_i32_0, %c0_i32_1 : i32, i32, i32
  }
  func.func @transform_6(%arg0: i32) -> (i32, i32) {
    %c0_i32 = arith.constant 0 : i32
    %c0_i32_0 = arith.constant 0 : i32
    %c0_i32_1 = arith.constant 0 : i32
    return %c0_i32, %c0_i32_0 : i32, i32
  }
  func.func @transform_7(%arg0: i32) -> (i32, i32) {
    %c0_i32 = arith.constant 0 : i32
    %c0_i32_0 = arith.constant 0 : i32
    %c0_i32_1 = arith.constant 0 : i32
    return %c0_i32, %c0_i32_0 : i32, i32
  }
  func.func @transform_8(%arg0: i32) -> (i32, i32) {
    %c0_i32 = arith.constant 0 : i32
    %c0_i32_0 = arith.constant 0 : i32
    %c0_i32_1 = arith.constant 0 : i32
    return %c0_i32, %c0_i32_0 : i32, i32
  }
  func.func @transform_9(%arg0: i32) -> (i32, i32, i32) {
    %c0_i32 = arith.constant 0 : i32
    %c0_i32_0 = arith.constant 0 : i32
    %c0_i32_1 = arith.constant 0 : i32
    return %arg0, %c0_i32, %c0_i32_0 : i32, i32, i32
  }
}

</mosaic_0001>

<bundles_post_ra>
// kernel: unet_up_forward.1
= control target key start
LH: loop header
LB: loop body
LE: loop exit
PB: predicated region body
PF: predicated region fallthrough
CT: control target
= control target key end

     0   :  { %14 = vsyncpa [#allocation6], 0  ;;  %s1321_s30 = smov 0   ;;  %s1790_s0 = inlined_call_operand.vmem [shape: f32[2,7,42], index: 0, kind: input, shape index: {}]   ;;  %s1791_s1 = inlined_call_operand.vmem [shape: f32[2,17,128], index: 1, kind: input, shape index: {}]   ;;  %s1792_s2 = inlined_call_operand.vmem [shape: f32[256,128], index: 2, kind: input, shape index: {}]   ;;  %s1793_s3 = inlined_call_operand.vmem [shape: f32[42,128], index: 3, kind: input, shape index: {}]   ;;  %s1794_s4 = inlined_call_operand.vmem [shape: f32[3,256,128], index: 4, kind: input, shape index: {}]   ;;  %s1795_s5 = inlined_call_operand.hbm [shape: f32[3,128,128], index: 5, kind: input, shape index: {}]   ;;  %s1796_s6 = inlined_call_operand.vmem [shape: f32[1,128], index: 6, kind: input, shape index: {}]   ;;  %s1797_s7 = inlined_call_operand.vmem [shape: f32[1,128], index: 7, kind: input, shape index: {}]   ;;  %s1798_s8 = inlined_call_operand.vmem [shape: f32[1,128], index: 8, kind: input, shape index: {}]   ;;  %s1799_s9 = inlined_call_operand.vmem [shape: f32[2,15,128], index: 9, kind: output, shape index: {}]  }
   0x1 LB: > { %s270_s12 = sshll.u32 %s1795_s5, 4  ;;  %s1110_s13 = sadd.s32 4294967295, %s1265_s30   ;;  %s1265_s30 = sphi %s1321_s30, %s20_s30   ;;  %s271_s12 = int_to_ptr.hbm [resolvable:$true] %s270_s12 }
   0x2   : > { %p1112_p0 = scmp.ge.s32.totalorder %s1265_s30, 1  ;;  %p250_p1 = scmp.lt.s32.totalorder %s1265_s30, 3 }
   0x3   : > { %p1208_p2 = scmp.eq.s32.totalorder %s1110_s13, 0  ;;  %s1267_s14 = smov [#allocation5]  }
   0x4   : > { %p251_p3 = pnand %p1112_p0, %p250_p1  ;;  %s272_s15 = sshll.u32 %s1267_s14, 4  ;;  %s273_s15 = int_to_ptr.vmem [resolvable:$true] %s272_s15 }
   0x5   : > { %s1268_s16 = smov 128   ;;  %s1269_s17 = smov 8  }
   0x6   : > { %p1204_p4 = pneg %p251_p3  ;;  %312 = sbr.rel (%p251_p3) target bundleno = 638 (0x27e), region = 56 }
   0x8   : > { %p1205_p5 = pnand %p1208_p2, %p1204_p4 }
   0xa   : > { %1207 = dma.hbm_to_vmem [thread:$0]  (!%p1205_p5), %s271_s12, 6144, %s273_s15, [#allocation6], %s1268_s16, %s1268_s16, %s1269_s17  }
   0xb   : > { %1260 = dma.done.wait (%p1208_p2), [#allocation6], 6144  }
   0xc   : > { %1262 = vsyncadd (%p1208_p2), [#allocation6], 4294961152  ;;  %p353_p6 = scmp.lt.s32.totalorder %s1110_s13, 1  ;;  %v1270_v0 = vmov 0.0   ;;  %vm460_vm0 = vcmask 1041408   ;;  %v394_v1 = vld [vmem:[%s1792_s2 + $0x78] sm:$0xff]  ;;  %v484_v46 = vlaneseq }
   0xd   : > { %368 = vst [vmem:[#allocation2] sm:$0xff] %v1270_v0  ;;  %v410_v2 = vld [vmem:[%s1792_s2 + $0xf8] sm:$0xff]  ;;  %v456_v3 = vld [vmem:[%s1793_s3 + $0x28] sm:$0x3]  ;;  %411 = vmatpush.msra.mxu0 %v394_v1  ;;  %v393_v4 = vld [vmem:[%s1792_s2 + $0x70] sm:$0xff]  ;;  %vm370_vm1 = vcmask 342016  }
   0xe   : > { %369 = vst [vmem:[#allocation2 + $0x8] sm:$0xff] %v1270_v0  ;;  %s1801_s13 = smov (!%p353_p6, %s1110_s13), 1  ;;  %431 = vmatpush.msra.mxu1 %v410_v2  ;;  %v409_v5 = vld [vmem:[%s1792_s2 + $0xf0] sm:$0xff]  ;;  %v455_v6 = vld [vmem:[%s1793_s3 + $0x20] sm:$0xff]  ;;  %1121 = vmatpush.msk.msra.mxu3 %vm460_vm0, %v456_v3  ;;  %v392_v7 = vld [vmem:[%s1792_s2 + $0x68] sm:$0xff]  ;;  %vm375_vm2 = vcmask 343041  }
   0xf   : > { %579 = vst [vmem:[#allocation3 + $0x8] sm:$0x1] %v1270_v0  ;;  %s1117_s24 = sshll.u32 %s1801_s13, 3  ;;  %s1199_s25 = smul.u32 24, %s1801_s13  ;;  %v408_v8 = vld [vmem:[%s1792_s2 + $0xe8] sm:$0xff]  ;;  %412 = vmatpush.msra.mxu0 %v393_v4  ;;  %v454_v9 = vld [vmem:[%s1793_s3 + $0x18] sm:$0xff] }
  0x10   : > { %580 = vst [vmem:[#allocation3] sm:$0x1] %v1270_v0  ;;  %432 = vmatpush.msra.mxu1 %v409_v5  ;;  %s356_s21 = scalar_lea.vmem %s1790_s0, %s1117_s24  ;;  %475 = vmatpush.msra.mxu3 %v455_v6  ;;  %v391_v10 = vld [vmem:[%s1792_s2 + $0x60] sm:$0xff]  ;;  %v453_v12 = vld [vmem:[%s1793_s3 + $0x10] sm:$0xff]  ;;  %v390_v13 = vld [vmem:[%s1792_s2 + $0x58] sm:$0xff]  ;;  %vm457_vm3 = vcmask 343040  }
  0x11   : > { %874 = vst [vmem:[#allocation4] sm:$0x1] %v1270_v0  ;;  %v407_v11 = vld [vmem:[%s1792_s2 + $0xe0] sm:$0xff]  ;;  %s361_s10 = scalar_lea.vmem %s1791_s1, %s1199_s25  ;;  %413 = vmatpush.msra.mxu0 %v392_v7  ;;  %v406_v14 = vld [vmem:[%s1792_s2 + $0xd8] sm:$0xff]  ;;  %v452_v16 = vld [vmem:[%s1793_s3 + $0x8] sm:$0xff]  ;;  %v488_v47 = vand.u32 127, %v484_v46 }
  0x12   : > { %875 = vst [vmem:[#allocation4 + $0x10] sm:$0x1] %v1270_v0  ;;  %433 = vmatpush.msra.mxu1 %v408_v8  ;;  %476 = vmatpush.msra.mxu3 %v454_v9  ;;  %v367_v15 = vld [vmem:[%s356_s21] sm:$0x7f]  ;;  %v389_v19 = vld [vmem:[%s1792_s2 + $0x50] sm:$0xff]  ;;  %v1404_v23 = vld [vmem:[%s361_s10 + $0x8] sm:$0xff] }
  0x13   : > { %414 = vmatpush.msra.mxu0 %v391_v10  ;;  %371 = vst.msk [vmem:[#allocation2] sm:$0x7f] %vm370_vm1, %v367_v15  ;;  %v373_v17 = vrot.slane %v367_v15, 7  ;;  %v1393_v18 = vld [vmem:[%s361_s10] sm:$0xff]  ;;  %v405_v20 = vld [vmem:[%s1792_s2 + $0xd0] sm:$0xff]  ;;  %v388_v24 = vld [vmem:[%s1792_s2 + $0x48] sm:$0xff] }
  0x14   : > { %434 = vmatpush.msra.mxu1 %v407_v11  ;;  %477 = vmatpush.msra.mxu3 %v453_v12  ;;  %v575_v21 = vld [vmem:[%s361_s10 + $0x10] sm:$0x1]  ;;  %v451_v22 = vld [vmem:[%s1793_s3] sm:$0xff]  ;;  %v404_v25 = vld [vmem:[%s1792_s2 + $0xc8] sm:$0xff]  ;;  %v489_v48 = vmul.u32 2, %v488_v47  ;;  %v485_v49 = vshrl.u32 %v484_v46, 7 }
  0x15   : > { %415 = vmatpush.msra.mxu0 %v390_v13  ;;  %376 = vst.msk [vmem:[#allocation2 + $0x8] sm:$0xfe] %vm375_vm2, %v373_v17  ;;  %v387_v26 = vld [vmem:[%s1792_s2 + $0x40] sm:$0xff]  ;;  %v386_v28 = vld [vmem:[%s1792_s2 + $0x38] sm:$0xff]  ;;  %v385_v30 = vld [vmem:[%s1792_s2 + $0x30] sm:$0xff]  ;;  %vm510_vm5 = vcmask 1046528  }
  0x16   : > { %435 = vmatpush.msra.mxu1 %v406_v14  ;;  %478 = vmatpush.msra.mxu3 %v452_v16  ;;  %578 = vst [vmem:[#allocation3 + $0x18] sm:$0x1] %v575_v21  ;;  %v403_v27 = vld [vmem:[%s1792_s2 + $0xc0] sm:$0xff]  ;;  %v402_v29 = vld [vmem:[%s1792_s2 + $0xb8] sm:$0xff]  ;;  %v401_v31 = vld [vmem:[%s1792_s2 + $0xb0] sm:$0xff]  ;;  %v496_v50 = vadd.s32 1, %v489_v48  ;;  %vm490_vm8 = vcmp.eq.s32.totalorder %v485_v49, %v489_v48 }
  0x17   : > { %416 = vmatpush.msra.mxu0 %v389_v19  ;;  %v384_v32 = vld [vmem:[%s1792_s2 + $0x28] sm:$0xff]  ;;  %v383_v34 = vld [vmem:[%s1792_s2 + $0x20] sm:$0xff]  ;;  %v382_v36 = vld [vmem:[%s1792_s2 + $0x18] sm:$0xff]  ;;  %vm503_vm6 = vcmask 56320   ;;  %v486_v57 = vadd.s32 8, %v485_v49  ;;  %v1123_v2 = vsel %vm490_vm8, 1.0, %v1270_v0 }
  0x18   : > { %436 = vmatpush.msra.mxu1 %v405_v20  ;;  %479 = vmatpush.msra.mxu3 %v451_v22  ;;  %v400_v33 = vld [vmem:[%s1792_s2 + $0xa8] sm:$0xff]  ;;  %v399_v35 = vld [vmem:[%s1792_s2 + $0xa0] sm:$0xff]  ;;  %v398_v37 = vld [vmem:[%s1792_s2 + $0x98] sm:$0xff]  ;;  %vm497_vm4 = vcmp.eq.s32.totalorder %v485_v49, %v496_v50  ;;  %vm537_vm9 = vcmask 64512   ;;  %vm811_vm11 = vcmask 1045504   ;;  %vm583_vm12 = vcmask 1040384  }
  0x19   : > { %1122 = vmatmul.msk.f32.vlgmr.msra.gmra.mxu3 %vm457_vm3, %v367_v15  ;;  %417 = vmatpush.msra.mxu0 %v388_v24  ;;  %v381_v38 = vld [vmem:[%s1792_s2 + $0x10] sm:$0xff]  ;;  %v380_v40 = vld [vmem:[%s1792_s2 + $0x8] sm:$0xff]  ;;  %v379_v42 = vld [vmem:[%s1792_s2] sm:$0xff]  ;;  %v1125_v55 = vsel %vm497_vm4, 1.0, %v1270_v0  ;;  %vm498_vm7 = vcmp.eq.s32.totalorder %v486_v57, %v496_v50  ;;  %vm491_vm10 = vcmp.eq.s32.totalorder %v486_v57, %v489_v48  ;;  %s1198_s16 = sshll.u32 %s1801_s13, 4 }
  0x1a   : > { %437 = vmatpush.msra.mxu1 %v404_v25  ;;  %v397_v39 = vld [vmem:[%s1792_s2 + $0x90] sm:$0xff]  ;;  %v396_v41 = vld [vmem:[%s1792_s2 + $0x88] sm:$0xff]  ;;  %v395_v43 = vld [vmem:[%s1792_s2 + $0x80] sm:$0xff]  ;;  %v1126_v61 = vsel %vm498_vm7, 1.0, %v1270_v0  ;;  %v1124_v7 = vsel %vm491_vm10, 1.0, %v1270_v0  ;;  %s366_s18 = scalar_lea.vmem %s1799_s9, %s1198_s16 }
  0x1b   : > { %418 = vmatpush.msra.mxu0 %v387_v26  ;;  %v377_v44 = vld [vmem:[#allocation2] sm:$0xff]  ;;  %v613_v51 = vld [vmem:[%s1794_s4 + $0x78] sm:$0xff]  ;;  %v612_v52 = vld [vmem:[%s1794_s4 + $0x70] sm:$0xff] }
  0x1c   : > { %438 = vmatpush.msra.mxu1 %v403_v27  ;;  %v378_v45 = vld [vmem:[#allocation2 + $0x8] sm:$0xff]  ;;  %630 = vmatpush.msra.mxu2 %v613_v51  ;;  %v610_v54 = vld [vmem:[%s1794_s4 + $0x60] sm:$0xff]  ;;  %v609_v58 = vld [vmem:[%s1794_s4 + $0x58] sm:$0xff] }
  0x1d   : > { %419 = vmatpush.msra.mxu0 %v386_v28  ;;  %v611_v53 = vld [vmem:[%s1794_s4 + $0x68] sm:$0xff]  ;;  %v608_v59 = vld [vmem:[%s1794_s4 + $0x50] sm:$0xff]  ;;  %v629_v3 = vld [vmem:[%s1794_s4 + $0xf8] sm:$0xff] }
  0x1e   : > { %439 = vmatpush.msra.mxu1 %v402_v29  ;;  %631 = vmatpush.msra.mxu2 %v612_v52  ;;  %v607_v60 = vld [vmem:[%s1794_s4 + $0x48] sm:$0xff]  ;;  %v628_v4 = vld [vmem:[%s1794_s4 + $0xf0] sm:$0xff]  ;;  %v626_v6 = vld [vmem:[%s1794_s4 + $0xe0] sm:$0xff] }
  0x1f   : > { %420 = vmatpush.msra.mxu0 %v385_v30  ;;  %v627_v5 = vld [vmem:[%s1794_s4 + $0xe8] sm:$0xff]  ;;  %v625_v8 = vld [vmem:[%s1794_s4 + $0xd8] sm:$0xff]  ;;  %v624_v9 = vld [vmem:[%s1794_s4 + $0xd0] sm:$0xff] }
  0x20   : > { %440 = vmatpush.msra.mxu1 %v401_v31  ;;  %632 = vmatpush.msra.mxu2 %v611_v53  ;;  %v623_v10 = vld [vmem:[%s1794_s4 + $0xc8] sm:$0xff]  ;;  %v606_v0 = vld [vmem:[%s1794_s4 + $0x40] sm:$0xff]  ;;  %v605_v12 = vld [vmem:[%s1794_s4 + $0x38] sm:$0xff] }
  0x21   : > { %421 = vmatpush.msra.mxu0 %v384_v32  ;;  %v622_v11 = vld [vmem:[%s1794_s4 + $0xc0] sm:$0xff]  ;;  %v621_v13 = vld [vmem:[%s1794_s4 + $0xb8] sm:$0xff]  ;;  %v604_v14 = vld [vmem:[%s1794_s4 + $0x30] sm:$0xff] }
  0x22   : > { %441 = vmatpush.msra.mxu1 %v400_v33  ;;  %633 = vmatpush.msra.mxu2 %v610_v54  ;;  %v620_v15 = vld [vmem:[%s1794_s4 + $0xb0] sm:$0xff]  ;;  %v603_v16 = vld [vmem:[%s1794_s4 + $0x28] sm:$0xff]  ;;  %v1147_v19 = vld [vmem:[%s1794_s4 + $0x178] sm:$0xff] }
  0x23   : > { %422 = vmatpush.msra.mxu0 %v383_v34  ;;  %v619_v17 = vld [vmem:[%s1794_s4 + $0xa8] sm:$0xff]  ;;  %v1163_v20 = vld [vmem:[%s1794_s4 + $0x1f8] sm:$0xff]  ;;  %v1146_v21 = vld [vmem:[%s1794_s4 + $0x170] sm:$0xff] }
  0x24   : > { %442 = vmatpush.msra.mxu1 %v399_v35  ;;  %634 = vmatpush.msra.mxu2 %v609_v58  ;;  %v1162_v22 = vld [vmem:[%s1794_s4 + $0x1f0] sm:$0xff]  ;;  %v602_v24 = vld [vmem:[%s1794_s4 + $0x20] sm:$0xff]  ;;  %v1145_v26 = vld [vmem:[%s1794_s4 + $0x168] sm:$0xff] }
  0x25   : > { %423 = vmatpush.msra.mxu0 %v382_v36  ;;  %v618_v25 = vld [vmem:[%s1794_s4 + $0xa0] sm:$0xff]  ;;  %v1161_v27 = vld [vmem:[%s1794_s4 + $0x1e8] sm:$0xff]  ;;  %v601_v28 = vld [vmem:[%s1794_s4 + $0x18] sm:$0xff] }
  0x26   : > { %443 = vmatpush.msra.mxu1 %v398_v37  ;;  %635 = vmatpush.msra.mxu2 %v608_v59  ;;  %v617_v29 = vld [vmem:[%s1794_s4 + $0x98] sm:$0xff]  ;;  %v600_v30 = vld [vmem:[%s1794_s4 + $0x10] sm:$0xff]  ;;  %v599_v32 = vld [vmem:[%s1794_s4 + $0x8] sm:$0xff] }
  0x27   : > { %424 = vmatpush.msra.mxu0 %v381_v38  ;;  %v616_v31 = vld [vmem:[%s1794_s4 + $0x90] sm:$0xff]  ;;  %v615_v33 = vld [vmem:[%s1794_s4 + $0x88] sm:$0xff]  ;;  %v1144_v34 = vld [vmem:[%s1794_s4 + $0x160] sm:$0xff] }
  0x28   : > { %444 = vmatpush.msra.mxu1 %v397_v39  ;;  %636 = vmatpush.msra.mxu2 %v607_v60  ;;  %v1160_v35 = vld [vmem:[%s1794_s4 + $0x1e0] sm:$0xff]  ;;  %v1143_v36 = vld [vmem:[%s1794_s4 + $0x158] sm:$0xff]  ;;  %v1142_v38 = vld [vmem:[%s1794_s4 + $0x150] sm:$0xff] }
  0x29   : > { %425 = vmatpush.msra.mxu0 %v380_v40  ;;  %v1159_v37 = vld [vmem:[%s1794_s4 + $0x1d8] sm:$0xff]  ;;  %v598_v39 = vld [vmem:[%s1794_s4] sm:$0xff]  ;;  %v1178_v46 = vld [vmem:[%s1794_s4 + $0x270] sm:$0xff] }
  0x2a   : > { %445 = vmatpush.msra.mxu1 %v396_v41  ;;  %637 = vmatpush.msra.mxu2 %v606_v0  ;;  %v614_v40 = vld [vmem:[%s1794_s4 + $0x80] sm:$0xff]  ;;  %v1158_v41 = vld [vmem:[%s1794_s4 + $0x1d0] sm:$0xff]  ;;  %v1177_v50 = vld [vmem:[%s1794_s4 + $0x268] sm:$0xff] }
  0x2b   : > { %426 = vmatpush.msra.mxu0 %v379_v42  ;;  %v1179_v42 = vld [vmem:[%s1794_s4 + $0x278] sm:$0xff]  ;;  %v1194_v47 = vld [vmem:[%s1794_s4 + $0x2f0] sm:$0xff]  ;;  %v1140_v48 = vld [vmem:[%s1794_s4 + $0x140] sm:$0xff] }
  0x2c   : > { %446 = vmatpush.msra.mxu1 %v395_v43  ;;  %427 = vmatmul.f32.vlgmr.msra.gmra.mxu0 %v377_v44  ;;  %v1195_v43 = vld [vmem:[%s1794_s4 + $0x2f8] sm:$0xff]  ;;  %v1141_v44 = vld [vmem:[%s1794_s4 + $0x148] sm:$0xff]  ;;  %v1156_v49 = vld [vmem:[%s1794_s4 + $0x1c0] sm:$0xff] }
  0x2d   : > { %447 = vmatmul.f32.vlgmr.msra.gmra.mxu1 %v378_v45  ;;  %638 = vmatpush.msra.mxu2 %v605_v12  ;;  %v1157_v45 = vld [vmem:[%s1794_s4 + $0x1c8] sm:$0xff]  ;;  %v1139_v52 = vld [vmem:[%s1794_s4 + $0x138] sm:$0xff]  ;;  %v1176_v54 = vld [vmem:[%s1794_s4 + $0x260] sm:$0xff] }
  0x2e   : > { %728 = vmatpush.msrb.mxu0 %v1147_v19  ;;  %751 = vmatpush.msrb.mxu1 %v1163_v20  ;;  %v1193_v51 = vld [vmem:[%s1794_s4 + $0x2e8] sm:$0xff]  ;;  %v1155_v53 = vld [vmem:[%s1794_s4 + $0x1b8] sm:$0xff]  ;;  %v1154_v57 = vld [vmem:[%s1794_s4 + $0x1b0] sm:$0xff]  ;;  %v722_v19 = vrot.slane %v1404_v23, 1 }
  0x2f   : > { %639 = vmatpush.msra.mxu2 %v604_v14  ;;  %v1175_v58 = vld [vmem:[%s1794_s4 + $0x258] sm:$0xff]  ;;  %v1137_v60 = vld [vmem:[%s1794_s4 + $0x128] sm:$0xff]  ;;  %v1170_v12 = vld [vmem:[%s1794_s4 + $0x230] sm:$0xff] }
  0x30   : > { %729 = vmatpush.msrb.mxu0 %v1146_v21  ;;  %752 = vmatpush.msrb.mxu1 %v1162_v22  ;;  %v1191_v59 = vld [vmem:[%s1794_s4 + $0x2d8] sm:$0xff]  ;;  %v1150_v14 = vld [vmem:[%s1794_s4 + $0x190] sm:$0xff]  ;;  %v1133_v20 = vld [vmem:[%s1794_s4 + $0x108] sm:$0xff] }
  0x31   : > { %640 = vmatpush.msra.mxu2 %v603_v16  ;;  %v1187_v0 = vld [vmem:[%s1794_s4 + $0x2b8] sm:$0xff]  ;;  %v1185_v16 = vld [vmem:[%s1794_s4 + $0x2a8] sm:$0xff]  ;;  %v1168_v22 = vld [vmem:[%s1794_s4 + $0x220] sm:$0xff] }
  0x32   : > { %730 = vmatpush.msrb.mxu0 %v1145_v26  ;;  %753 = vmatpush.msrb.mxu1 %v1161_v27  ;;  %v1149_v21 = vld [vmem:[%s1794_s4 + $0x188] sm:$0xff]  ;;  %v1148_v26 = vld [vmem:[%s1794_s4 + $0x180] sm:$0xff] }
  0x33   : > { %641 = vmatpush.msra.mxu2 %v602_v24  ;;  %v1184_v24 = vld [vmem:[%s1794_s4 + $0x2a0] sm:$0xff] }
  0x34   : > { %731 = vmatpush.msrb.mxu0 %v1144_v34  ;;  %754 = vmatpush.msrb.mxu1 %v1160_v35  ;;  %v1181_v34 = vld [vmem:[%s1794_s4 + $0x288] sm:$0xff]  ;;  %v815_v35 = vrot.slane %v1393_v18, 2 }
  0x35   : > { %642 = vmatpush.msra.mxu2 %v601_v28  ;;  %v1167_v28 = vld [vmem:[%s1794_s4 + $0x218] sm:$0xff] }
  0x36   : > { %732 = vmatpush.msrb.mxu0 %v1143_v36  ;;  %755 = vmatpush.msrb.mxu1 %v1159_v37  ;;  %v816_v36 = vrot.slane %v1404_v23, 2  ;;  %v1164_v37 = vld [vmem:[%s1794_s4 + $0x200] sm:$0xff] }
  0x37   : > { %643 = vmatpush.msra.mxu2 %v600_v30  ;;  %v1166_v30 = vld [vmem:[%s1794_s4 + $0x210] sm:$0xff] }
  0x38   : > { %733 = vmatpush.msrb.mxu0 %v1142_v38  ;;  %756 = vmatpush.msrb.mxu1 %v1158_v41  ;;  %v1180_v38 = vld [vmem:[%s1794_s4 + $0x280] sm:$0xff] }
  0x39   : > { %644 = vmatpush.msra.mxu2 %v599_v32  ;;  %v1182_v32 = vld [vmem:[%s1794_s4 + $0x290] sm:$0xff] }
  0x3a   : > { %734 = vmatpush.msrb.mxu0 %v1141_v44  ;;  %757 = vmatpush.msrb.mxu1 %v1157_v45 }
  0x3b   : > { %645 = vmatpush.msra.mxu2 %v598_v39  ;;  %v817_v39 = vsel %vm811_vm11, %v815_v35, %v816_v36  ;;  %v884_v35 = vld [vmem:[#allocation5] sm:$0xff] }
  0x3c   : > { %735 = vmatpush.msrb.mxu0 %v1140_v48  ;;  %758 = vmatpush.msrb.mxu1 %v1156_v49 }
  0x3d   : > { %826 = vmatpush.msrb.mxu2 %v1179_v42  ;;  %v596_v42 = vld [vmem:[#allocation3 + $0x18] sm:$0x1] }
  0x3e   : > { %736 = vmatpush.msrb.mxu0 %v1139_v52  ;;  %759 = vmatpush.msrb.mxu1 %v1155_v53 }
  0x3f   : > { %827 = vmatpush.msrb.mxu2 %v1178_v46 }
  0x40   : > { %760 = vmatpush.msrb.mxu1 %v1154_v57 }
  0x41   : > { %828 = vmatpush.msrb.mxu2 %v1177_v50 }
  0x43   : > { %829 = vmatpush.msrb.mxu2 %v1176_v54 }
  0x45   : > { %830 = vmatpush.msrb.mxu2 %v1175_v58  ;;  %v595_v58 = vld [vmem:[#allocation3] sm:$0x1] }
  0x9c   : > { %v481_v56 = vpop.f32.mrf.mxu3 }
  0x9d   : > { %1127 = vmatpush.msk.msrb.mxu3 %vm510_vm5, %v481_v56  ;;  %v1138_v56 = vld [vmem:[%s1794_s4 + $0x130] sm:$0xff] }
  0x9e   : > { %1128 = vmatmul.msk.f32.vlgmr.msrb.gmra.mxu3 %vm503_vm6, %v1125_v55  ;;  %v1192_v55 = vld [vmem:[%s1794_s4 + $0x2e0] sm:$0xff]  ;;  %737 = vmatpush.msrb.mxu0 %v1138_v56 }
  0xa0   : > { %738 = vmatpush.msrb.mxu0 %v1137_v60 }
  0xa6   : > { %1129 = vmatmul.msk.f32.gmra.mxu3 %vm503_vm6, %v1126_v61  ;;  %v1174_v61 = vld [vmem:[%s1794_s4 + $0x250] sm:$0xff] }
  0xa7   : > { %831 = vmatpush.msrb.mxu2 %v1174_v61  ;;  %v899_v61 = vld [vmem:[#allocation5 + $0x78] sm:$0xff] }
  0xa9   : > { %v428_v62 = vpop.f32.mrf.mxu0 }
  0xaa   : > { %v448_v63 = vpop.f32.mrf.mxu1 }
  0xab   : > { %v449_v1 = vadd.f32 %v448_v63, %v428_v62  ;;  %v1190_v62 = vld [vmem:[%s1794_s4 + $0x2d0] sm:$0xff]  ;;  %v1153_v63 = vld [vmem:[%s1794_s4 + $0x1a8] sm:$0xff] }
  0xac   : > { %761 = vmatpush.msrb.mxu1 %v1153_v63  ;;  %v897_v63 = vld [vmem:[#allocation5 + $0x68] sm:$0xff] }
  0xad   : > { %559 = vmatpush.msra.mxu3 %v449_v1  ;;  %v1136_v1 = vld [vmem:[%s1794_s4 + $0x120] sm:$0xff] }
  0xae   : > { %1130 = vmatmul.msk.f32.vlgmr.msra.gmra.mxu3 %vm537_vm9, %v1123_v2  ;;  %v1173_v2 = vld [vmem:[%s1794_s4 + $0x248] sm:$0xff]  ;;  %739 = vmatpush.msrb.mxu0 %v1136_v1  ;;  %v896_v1 = vld [vmem:[#allocation5 + $0x60] sm:$0xff] }
  0xaf   : > { %653 = vmatpush.msrb.mxu3 %v629_v3  ;;  %v1189_v3 = vld [vmem:[%s1794_s4 + $0x2c8] sm:$0xff]  ;;  %832 = vmatpush.msrb.mxu2 %v1173_v2  ;;  %v895_v2 = vld [vmem:[#allocation5 + $0x58] sm:$0xff] }
  0xb1   : > { %654 = vmatpush.msrb.mxu3 %v628_v4  ;;  %v1152_v4 = vld [vmem:[%s1794_s4 + $0x1a0] sm:$0xff] }
  0xb2   : > { %762 = vmatpush.msrb.mxu1 %v1152_v4  ;;  %v944_v4 = vld [vmem:[#allocation5 + $0xf8] sm:$0xff] }
  0xb3   : > { %655 = vmatpush.msrb.mxu3 %v627_v5  ;;  %v1135_v5 = vld [vmem:[%s1794_s4 + $0x118] sm:$0xff] }
  0xb4   : > { %740 = vmatpush.msrb.mxu0 %v1135_v5  ;;  %v993_v5 = vld [vmem:[#allocation5 + $0x178] sm:$0xff] }
  0xb5   : > { %656 = vmatpush.msrb.mxu3 %v626_v6  ;;  %v1172_v6 = vld [vmem:[%s1794_s4 + $0x240] sm:$0xff] }
  0xb6   : > { %1131 = vmatmul.msk.f32.gmra.mxu3 %vm537_vm9, %v1124_v7  ;;  %v1188_v7 = vld [vmem:[%s1794_s4 + $0x2c0] sm:$0xff]  ;;  %833 = vmatpush.msrb.mxu2 %v1172_v6 }
  0xb7   : > { %657 = vmatpush.msrb.mxu3 %v625_v8  ;;  %v1151_v8 = vld [vmem:[%s1794_s4 + $0x198] sm:$0xff]  ;;  %v893_v6 = vld [vmem:[#allocation5 + $0x48] sm:$0xff] }
  0xb8   : > { %763 = vmatpush.msrb.mxu1 %v1151_v8  ;;  %v992_v8 = vld [vmem:[#allocation5 + $0x170] sm:$0xff] }
  0xb9   : > { %658 = vmatpush.msrb.mxu3 %v624_v9  ;;  %v1134_v9 = vld [vmem:[%s1794_s4 + $0x110] sm:$0xff] }
  0xba   : > { %741 = vmatpush.msrb.mxu0 %v1134_v9  ;;  %764 = vmatpush.msrb.mxu1 %v1150_v14  ;;  %v892_v9 = vld [vmem:[#allocation5 + $0x40] sm:$0xff]  ;;  %v890_v14 = vld [vmem:[#allocation5 + $0x30] sm:$0xff] }
  0xbb   : > { %659 = vmatpush.msrb.mxu3 %v623_v10  ;;  %v1171_v10 = vld [vmem:[%s1794_s4 + $0x238] sm:$0xff] }
  0xbc   : > { %834 = vmatpush.msrb.mxu2 %v1171_v10  ;;  %742 = vmatpush.msrb.mxu0 %v1133_v20  ;;  %v942_v10 = vld [vmem:[#allocation5 + $0xe8] sm:$0xff]  ;;  %v988_v20 = vld [vmem:[#allocation5 + $0x150] sm:$0xff] }
  0xbd   : > { %660 = vmatpush.msrb.mxu3 %v622_v11  ;;  %765 = vmatpush.msrb.mxu1 %v1149_v21  ;;  %v888_v21 = vld [vmem:[#allocation5 + $0x20] sm:$0xff] }
  0xbe   : > { %835 = vmatpush.msrb.mxu2 %v1170_v12  ;;  %v941_v12 = vld [vmem:[#allocation5 + $0xe0] sm:$0xff] }
  0xbf   : > { %661 = vmatpush.msrb.mxu3 %v621_v13  ;;  %v1186_v13 = vld [vmem:[%s1794_s4 + $0x2b0] sm:$0xff]  ;;  %766 = vmatpush.msrb.mxu1 %v1148_v26 }
  0xc1   : > { %662 = vmatpush.msrb.mxu3 %v620_v15  ;;  %v1169_v15 = vld [vmem:[%s1794_s4 + $0x228] sm:$0xff]  ;;  %952 = vmatpush.msra.mxu1 %v944_v4 }
  0xc2   : > { %836 = vmatpush.msrb.mxu2 %v1169_v15  ;;  %v940_v15 = vld [vmem:[#allocation5 + $0xd8] sm:$0xff] }
  0xc3   : > { %663 = vmatpush.msrb.mxu3 %v619_v17  ;;  %v721_v17 = vrot.slane %v1393_v18, 1 }
  0xc4   : > { %837 = vmatpush.msrb.mxu2 %v1168_v22  ;;  %v938_v22 = vld [vmem:[#allocation5 + $0xc8] sm:$0xff] }
  0xc5   : > { %664 = vmatpush.msrb.mxu3 %v618_v25  ;;  %v1132_v25 = vld [vmem:[%s1794_s4 + $0x100] sm:$0xff]  ;;  %v723_v27 = vsel %vm510_vm5, %v721_v17, %v722_v19 }
  0xc6   : > { %743 = vmatpush.msrb.mxu0 %v1132_v25  ;;  %838 = vmatpush.msrb.mxu2 %v1167_v28  ;;  %v889_v17 = vld [vmem:[#allocation5 + $0x28] sm:$0xff]  ;;  %v887_v25 = vld [vmem:[#allocation5 + $0x18] sm:$0xff]  ;;  %v986_v28 = vld [vmem:[#allocation5 + $0x140] sm:$0xff] }
  0xc7   : > { %665 = vmatpush.msrb.mxu3 %v617_v29  ;;  %v1183_v29 = vld [vmem:[%s1794_s4 + $0x298] sm:$0xff]  ;;  %767 = vmatmul.f32.vlgmr.msrb.gmra.mxu1 %v723_v27 }
  0xc8   : > { %839 = vmatpush.msrb.mxu2 %v1166_v30  ;;  %900 = vmatpush.msra.mxu0 %v899_v61  ;;  %v937_v27 = vld [vmem:[#allocation5 + $0xc0] sm:$0xff]  ;;  %v936_v30 = vld [vmem:[#allocation5 + $0xb8] sm:$0xff] }
  0xc9   : > { %666 = vmatpush.msrb.mxu3 %v616_v31 }
  0xcb   : > { %667 = vmatpush.msrb.mxu3 %v615_v33  ;;  %v1165_v33 = vld [vmem:[%s1794_s4 + $0x208] sm:$0xff] }
  0xcc   : > { %840 = vmatpush.msrb.mxu2 %v1165_v33  ;;  %v935_v33 = vld [vmem:[#allocation5 + $0xb0] sm:$0xff] }
  0xcd   : > { %668 = vmatpush.msrb.mxu3 %v614_v40 }
  0xce   : > { %669 = vmatmul.f32.vlgmr.msrb.gmra.mxu3 %v1393_v18  ;;  %841 = vmatpush.msrb.mxu2 %v1164_v37  ;;  %v1222_v18 = vld [vmem:[%s1796_s6] ss:$0 sm:$0xff] }
  0xcf   : > { %849 = vmatpush.msra.mxu3 %v1195_v43  ;;  %770 = vmatmul.f32.gmra.mxu1 %v722_v19  ;;  %v820_v43 = vrot.slane %v596_v42, 2  ;;  %v939_v19 = vld [vmem:[#allocation5 + $0xd0] sm:$0xff]  ;;  %v983_v37 = vld [vmem:[#allocation5 + $0x128] sm:$0xff] }
  0xd0   : > { %v931_v42 = vld [vmem:[#allocation5 + $0x90] sm:$0xff] }
  0xd1   : > { %850 = vmatpush.msra.mxu3 %v1194_v47  ;;  %v821_v45 = vsel %vm811_vm11, %v816_v36, %v820_v43  ;;  %v934_v36 = vld [vmem:[#allocation5 + $0xa8] sm:$0xff]  ;;  %v980_v43 = vld [vmem:[#allocation5 + $0x110] sm:$0xff] }
  0xd3   : > { %851 = vmatpush.msra.mxu3 %v1193_v51 }
  0xd5   : > { %852 = vmatpush.msra.mxu3 %v1192_v55 }
  0xd6   : > { %672 = vmatmul.f32.gmra.mxu3 %v1404_v23 }
  0xd7   : > { %853 = vmatpush.msra.mxu3 %v1191_v59  ;;  %v818_v59 = vrot.slane %v595_v58, 2 }
  0xd9   : > { %854 = vmatpush.msra.mxu3 %v1190_v62  ;;  %v898_v62 = vld [vmem:[#allocation5 + $0x70] sm:$0xff] }
  0xda   : > { %901 = vmatpush.msra.mxu0 %v898_v62 }
  0xdb   : > { %855 = vmatpush.msra.mxu3 %v1189_v3  ;;  %v894_v3 = vld [vmem:[#allocation5 + $0x50] sm:$0xff] }
  0xdc   : > { %902 = vmatpush.msra.mxu0 %v897_v63 }
  0xdd   : > { %856 = vmatpush.msra.mxu3 %v1188_v7  ;;  %v943_v7 = vld [vmem:[#allocation5 + $0xf0] sm:$0xff] }
  0xde   : > { %903 = vmatpush.msra.mxu0 %v896_v1  ;;  %953 = vmatpush.msra.mxu1 %v943_v7 }
  0xdf   : > { %857 = vmatpush.msra.mxu3 %v1187_v0  ;;  %v991_v0 = vld [vmem:[#allocation5 + $0x168] sm:$0xff] }
  0xe0   : > { %904 = vmatpush.msra.mxu0 %v895_v2  ;;  %954 = vmatpush.msra.mxu1 %v942_v10 }
  0xe1   : > { %858 = vmatpush.msra.mxu3 %v1186_v13  ;;  %v990_v13 = vld [vmem:[#allocation5 + $0x160] sm:$0xff] }
  0xe2   : > { %905 = vmatpush.msra.mxu0 %v894_v3  ;;  %955 = vmatpush.msra.mxu1 %v941_v12 }
  0xe3   : > { %859 = vmatpush.msra.mxu3 %v1185_v16  ;;  %v989_v16 = vld [vmem:[#allocation5 + $0x158] sm:$0xff] }
  0xe4   : > { %906 = vmatpush.msra.mxu0 %v893_v6  ;;  %956 = vmatpush.msra.mxu1 %v940_v15 }
  0xe5   : > { %860 = vmatpush.msra.mxu3 %v1184_v24  ;;  %v987_v24 = vld [vmem:[#allocation5 + $0x148] sm:$0xff] }
  0xe6   : > { %907 = vmatpush.msra.mxu0 %v892_v9  ;;  %957 = vmatpush.msra.mxu1 %v939_v19 }
  0xe7   : > { %861 = vmatpush.msra.mxu3 %v1183_v29  ;;  %v886_v29 = vld [vmem:[#allocation5 + $0x10] sm:$0xff] }
  0xe8   : > { %958 = vmatpush.msra.mxu1 %v938_v22 }
  0xe9   : > { %862 = vmatpush.msra.mxu3 %v1182_v32  ;;  %v885_v32 = vld [vmem:[#allocation5 + $0x8] sm:$0xff] }
  0xea   : > { %959 = vmatpush.msra.mxu1 %v937_v27 }
  0xeb   : > { %863 = vmatpush.msra.mxu3 %v1181_v34  ;;  %v984_v34 = vld [vmem:[#allocation5 + $0x130] sm:$0xff] }
  0xec   : > { %960 = vmatpush.msra.mxu1 %v936_v30 }
  0xed   : > { %864 = vmatpush.msra.mxu3 %v1180_v38  ;;  %v933_v38 = vld [vmem:[#allocation5 + $0xa0] sm:$0xff] }
  0xee   : > { %865 = vmatmul.f32.vlgmr.msra.gmra.mxu3 %v817_v39  ;;  %961 = vmatpush.msra.mxu1 %v935_v33  ;;  %v982_v39 = vld [vmem:[#allocation5 + $0x120] sm:$0xff] }
  0xf0   : > { %962 = vmatpush.msra.mxu1 %v934_v36 }
  0xf2   : > { %963 = vmatpush.msra.mxu1 %v933_v38 }
  0xf6   : > { %868 = vmatmul.f32.gmra.mxu3 %v821_v45  ;;  %v979_v45 = vld [vmem:[#allocation5 + $0x108] sm:$0xff] }
 0x121   : > { %v531_v11 = vpop.f32.mrf.mxu3 }
 0x129   : > { %v534_v31 = vpop.f32.mrf.mxu3 }
 0x131   : > { %v561_v23 = vpop.f32.mrf.mxu3 }
 0x132   : > { %v562_v40 = vadd.f32 %v561_v23, %v531_v11  ;;  %v891_v11 = vld [vmem:[#allocation5 + $0x38] sm:$0xff] }
 0x133   : > { %908 = vmatpush.msra.mxu0 %v891_v11  ;;  %v932_v23 = vld [vmem:[#allocation5 + $0x98] sm:$0xff] }
 0x134   : > { %v571_v41 = vadd.f32 %v1222_v18, %v562_v40  ;;  %v981_v40 = vld [vmem:[#allocation5 + $0x118] sm:$0xff]  ;;  %964 = vmatpush.msra.mxu1 %v932_v23 }
 0x135   : > { %909 = vmatpush.msra.mxu0 %v890_v14 }
 0x136   : > { %v584_v44 = vrot.slane %v571_v41, 7  ;;  %965 = vmatpush.msra.mxu1 %v931_v42 }
 0x137   : > { %910 = vmatpush.msra.mxu0 %v889_v17 }
 0x138   : > { %589 = vst [vmem:[#allocation3 + $0x8] sm:$0xfe] %v584_v44 }
 0x139   : > { %v564_v46 = vpop.f32.mrf.mxu3  ;;  %911 = vmatpush.msra.mxu0 %v888_v21  ;;  %v1224_v21 = vld [vmem:[%s1798_s8] ss:$0 sm:$0xff] }
 0x13a   : > { %v565_v47 = vadd.f32 %v564_v46, %v534_v31  ;;  %v985_v31 = vld [vmem:[#allocation5 + $0x138] sm:$0xff]  ;;  %v929_v46 = vld [vmem:[#allocation5 + $0x80] sm:$0xff] }
 0x13b   : > { %912 = vmatpush.msra.mxu0 %v887_v25 }
 0x13c   : > { %v572_v48 = vadd.f32 %v1222_v18, %v565_v47  ;;  %v978_v47 = vld [vmem:[#allocation5 + $0x100] sm:$0xff] }
 0x13d   : > { %913 = vmatpush.msra.mxu0 %v886_v29 }
 0x13e   : > { %v585_v49 = vrot.slane %v572_v48, 7 }
 0x13f   : > { %v591_v50 = vld [vmem:[#allocation3 + $0x8] sm:$0xff]  ;;  %914 = vmatpush.msra.mxu0 %v885_v32 }
 0x140   : > { %v586_v51 = vsel %vm583_vm12, %v584_v44, %v585_v49  ;;  %646 = vmatmul.f32.vlgmr.msra.gmra.mxu2 %v591_v50  ;;  %v718_v52 = vrot.slane %v591_v50, 1  ;;  %v812_v55 = vrot.slane %v591_v50, 2  ;;  %v930_v44 = vld [vmem:[#allocation5 + $0x88] sm:$0xff] }
 0x141   : > { %v719_v53 = vrot.slane %v586_v51, 1  ;;  %v813_v56 = vrot.slane %v586_v51, 2  ;;  %1002 = vmatpush.msra.mxu2 %v993_v5  ;;  %915 = vmatpush.msra.mxu0 %v884_v35  ;;  %v1223_v50 = vld [vmem:[%s1797_s7] ss:$0 sm:$0xff] }
 0x142   : > { %966 = vmatpush.msra.mxu1 %v930_v44 }
 0x143   : > { %v720_v54 = vsel %vm510_vm5, %v718_v52, %v719_v53  ;;  %v814_v57 = vsel %vm811_vm11, %v812_v55, %v813_v56  ;;  %v819_v60 = vsel %vm811_vm11, %v813_v56, %v818_v59  ;;  %1003 = vmatpush.msra.mxu2 %v992_v8 }
 0x144   : > { %744 = vmatmul.f32.vlgmr.msrb.gmra.mxu0 %v720_v54  ;;  %967 = vmatpush.msra.mxu1 %v929_v46  ;;  %v768_v52 = vpop.f32.mrf.mxu1 }
 0x145   : > { %1004 = vmatpush.msra.mxu2 %v991_v0 }
 0x147   : > { %1005 = vmatpush.msra.mxu2 %v990_v13 }
 0x148   : > { %649 = vmatmul.f32.gmra.mxu2 %v586_v51 }
 0x149   : > { %1006 = vmatpush.msra.mxu2 %v989_v16  ;;  %v882_v16 = vld [vmem:[#allocation4 + $0x10] sm:$0x1] }
 0x14a   : > { %v998_v17 = vrot.slane %v882_v16, 2 }
 0x14b   : > { %1007 = vmatpush.msra.mxu2 %v988_v20 }
 0x14c   : > { %747 = vmatmul.f32.gmra.mxu0 %v719_v53  ;;  %v771_v62 = vpop.f32.mrf.mxu1 }
 0x14d   : > { %1008 = vmatpush.msra.mxu2 %v987_v24 }
 0x14f   : > { %1009 = vmatpush.msra.mxu2 %v986_v28 }
 0x150   : > { %842 = vmatmul.f32.vlgmr.msrb.gmra.mxu2 %v814_v57 }
 0x151   : > { %v670_v26 = vpop.f32.mrf.mxu3  ;;  %1010 = vmatpush.msra.mxu2 %v985_v31 }
 0x153   : > { %1011 = vmatpush.msra.mxu2 %v984_v34 }
 0x155   : > { %1012 = vmatpush.msra.mxu2 %v983_v37 }
 0x157   : > { %1013 = vmatpush.msra.mxu2 %v982_v39 }
 0x158   : > { %845 = vmatmul.f32.gmra.mxu2 %v819_v60 }
 0x159   : > { %v673_v41 = vpop.f32.mrf.mxu3  ;;  %1014 = vmatpush.msra.mxu2 %v981_v40 }
 0x15b   : > { %1015 = vmatpush.msra.mxu2 %v980_v43 }
 0x15d   : > { %1016 = vmatpush.msra.mxu2 %v979_v45 }
 0x15f   : > { %1017 = vmatpush.msra.mxu2 %v978_v47 }
 0x171   : > { %v866_v53 = vpop.f32.mrf.mxu3 }
 0x179   : > { %v869_v2 = vpop.f32.mrf.mxu3 }
 0x1c1   : > { %v745_v51 = vpop.f32.mrf.mxu0 }
 0x1c2   : > { %v769_v55 = vadd.f32 %v768_v52, %v745_v51 }
 0x1c3   : > { %v647_v18 = vpop.f32.mrf.mxu2 }
 0x1c4   : > { %v671_v49 = vadd.f32 %v670_v26, %v647_v18 }
 0x1c6   : > { %v679_v54 = vadd.f32 %v1223_v50, %v671_v49 }
 0x1c8   : > { %v774_v57 = vadd.f32 %v769_v55, %v679_v54 }
 0x1c9   : > { %v748_v61 = vpop.f32.mrf.mxu0 }
 0x1ca   : > { %v772_v3 = vadd.f32 %v771_v62, %v748_v61 }
 0x1cb   : > { %v650_v48 = vpop.f32.mrf.mxu2 }
 0x1cc   : > { %v674_v58 = vadd.f32 %v673_v41, %v650_v48 }
 0x1ce   : > { %v680_v63 = vadd.f32 %v1223_v50, %v674_v58 }
 0x1d0   : > { %v775_v5 = vadd.f32 %v772_v3, %v680_v63 }
 0x1d3   : > { %v843_v56 = vpop.f32.mrf.mxu2 }
 0x1d4   : > { %v867_v59 = vadd.f32 %v866_v53, %v843_v56 }
 0x1d6   : > { %v872_v60 = vadd.f32 %v867_v59, %v774_v57 }
 0x1d8   : > { %v876_v1 = vmax.f32 %v872_v60, 0.0 }
 0x1da   : > { %878 = vst [vmem:[#allocation4 + $0x1] sm:$0xff] %v876_v1 }
 0x1db   : > { %v846_v4 = vpop.f32.mrf.mxu2 }
 0x1dc   : > { %v870_v6 = vadd.f32 %v869_v2, %v846_v4 }
 0x1de   : > { %v873_v7 = vadd.f32 %v870_v6, %v775_v5 }
 0x1e0   : > { %v877_v8 = vmax.f32 %v873_v7, 0.0 }
 0x1e1   : > { %v880_v9 = vld [vmem:[#allocation4] sm:$0xff] }
 0x1e2   : > { %879 = vst [vmem:[#allocation4 + $0x9] sm:$0x7f] %v877_v8  ;;  %916 = vmatmul.f32.vlgmr.msra.gmra.mxu0 %v880_v9  ;;  %v947_v0 = vrot.slane %v880_v9, 1  ;;  %v995_v11 = vrot.slane %v880_v9, 2 }
 0x1e9   : > { %v881_v10 = vld [vmem:[#allocation4 + $0x8] sm:$0xff] }
 0x1ea   : > { %919 = vmatmul.f32.gmra.mxu0 %v881_v10  ;;  %v948_v12 = vrot.slane %v881_v10, 1  ;;  %v996_v13 = vrot.slane %v881_v10, 2 }
 0x1ec   : > { %v949_v14 = vsel %vm510_vm5, %v947_v0, %v948_v12  ;;  %v997_v15 = vsel %vm811_vm11, %v995_v11, %v996_v13  ;;  %v999_v19 = vsel %vm811_vm11, %v996_v13, %v998_v17 }
 0x1ed   : > { %968 = vmatmul.f32.vlgmr.msra.gmra.mxu1 %v949_v14  ;;  %1018 = vmatmul.f32.vlgmr.msra.gmra.mxu2 %v997_v15 }
 0x1f5   : > { %971 = vmatmul.f32.gmra.mxu1 %v948_v12  ;;  %1021 = vmatmul.f32.gmra.mxu2 %v999_v19 }
 0x25f   : > { %v917_v20 = vpop.f32.mrf.mxu0 }
 0x260   : > { %v926_v24 = vadd.f32 %v1224_v21, %v917_v20 }
 0x267   : > { %v920_v28 = vpop.f32.mrf.mxu0 }
 0x268   : > { %v927_v31 = vadd.f32 %v1224_v21, %v920_v28 }
 0x26a   : > { %v969_v22 = vpop.f32.mrf.mxu1 }
 0x26b   : > { %v975_v25 = vadd.f32 %v969_v22, %v926_v24 }
 0x270   : > { %v1019_v26 = vpop.f32.mrf.mxu2 }
 0x271   : > { %v1025_v27 = vadd.f32 %v1019_v26, %v975_v25 }
 0x272   : > { %v972_v30 = vpop.f32.mrf.mxu1 }
 0x273   : > { %v1027_v29 = vmax.f32 %v1025_v27, 0.0  ;;  %v976_v32 = vadd.f32 %v972_v30, %v927_v31 }
 0x275   : > { %1029 = vst [vmem:[%s366_s18] sm:$0xff] %v1027_v29 }
 0x278   : > { %v1022_v33 = vpop.f32.mrf.mxu2 }
 0x279   : > { %v1026_v34 = vadd.f32 %v1022_v33, %v976_v32 }
 0x27b   : > { %v1028_v35 = vmax.f32 %v1026_v34, 0.0 }
 0x27d   : > { %1030 = vst [vmem:[%s366_s18 + $0x8] sm:$0x7f] %v1028_v35 }
 0x27e PF: > { %s20_s30 = sadd.s32 1, %s1265_s30  }
 0x27f   : > { %p17_p7 = scmp.ge.s32.totalorder %s20_s30, 4  }
 0x281   :  { %19 = sbr.rel (!%p17_p7) target bundleno = 1 (0x1), region = 98 }
 0x286   :  { %1052 = vsyncpa [#allocation6], 1 }
 0x287   :  { %1054 = vsyncpa [#allocation6 + $0x1], 1 }

</bundles_post_ra>
